<compile_context>
chip_gen: v7x
topology: tpu7x:2x2x1
jax: 0.10.0
libtpu: 0.0.40
codegen_flags: <defaults>
</compile_context>

<pallas_src>
import jax
import jax.numpy as jnp
from jax.experimental import pallas as pl
from jax.experimental.pallas import tpu as pltpu


def _copy_kernel(x_ref, o_ref):
    # Pure identity copy of a lane-dense (tile_rows, C) block.
    o_ref[...] = x_ref[...]


def _choose_lane_width(n, max_c=32768):
    """Largest multiple of 128 that divides n (capped at max_c), or None."""
    best = None
    c = 128
    limit = min(max_c, n)
    while c <= limit:
        if n % c == 0:
            best = c
        c += 128
    return best


def _sublane_multiple(dtype) -> int:
    # Native sublane tile: 8 rows for 32-bit, 16 for 16-bit, 32 for 8-bit.
    itemsize = jnp.dtype(dtype).itemsize
    return max(8, 32 // max(1, itemsize))


def _target_block_bytes() -> int:
    # (1 in + 1 out) x 2 double-buffers x tile must stay well inside the
    # default scoped-VMEM limit on every generation (16 MiB v5e, 32 MiB
    # v6e/v7x).  A 3 MiB tile -> 12 MiB of buffers fits everywhere; also cap
    # at 1/16 of physical VMEM (v7x only has 64 MiB per TC).
    base = 3 << 20
    try:
        vmem = pltpu.get_tpu_info().vmem_capacity_bytes
        return int(max(1 << 20, min(base, vmem // 16)))
    except Exception:
        return base


def _choose_tile_rows(r, row_bytes, sub, n_bytes, target_bytes):
    """Pick a tile row count: VMEM-budgeted, >=4 (even) steps for big copies,
    sublane-aligned, and an exact divisor of r when one exists."""
    budget_rows = max(sub, (target_bytes // row_bytes) // sub * sub)

    # Pipelining only pays once there is real data to overlap.
    min_steps = 4 if n_bytes > (2 << 20) else 1
    if min_steps > 1:
        step_rows = (r // min_steps) // sub * sub
        cap = min(budget_rows, step_rows) if step_rows >= sub else sub
        cap = min(cap, budget_rows)
    else:
        cap = budget_rows

    if r <= cap:
        return r  # full extent: always legal; small one-shot copy.

    # Prefer an exact divisor of r (no masked tail store), and among divisors
    # prefer an even step count so both v7x TensorCores are load-balanced.
    best_any = None
    t = cap
    while t >= sub:
        if r % t == 0:
            if (r // t) % 2 == 0:
                return t
            if best_any is None:
                best_any = t
        t -= sub
    if best_any is not None:
        return best_any
    return cap  # masked tail on the last step only.


def squeeze_pallas(x: jax.Array, dim: int) -> jax.Array:
    """Equivalent of torch.Tensor.squeeze(dim=dim)."""
    nd = x.ndim
    d = dim % nd

    # PyTorch semantics: squeezing a non-unit dim is a no-op.
    if x.shape[d] != 1:
        return x

    out_shape = x.shape[:d] + x.shape[d + 1:]
    n = x.size

    # Zero-cost metadata fallback when the flat size is not lane-tileable or
    # the result is rank-0.  (This reshape is what production code should use
    # for squeeze anyway — it costs no HBM traffic.)
    c = _choose_lane_width(n) if n > 0 else None
    if len(out_shape) == 0 or c is None:
        return jnp.reshape(x, out_shape)

    itemsize = jnp.dtype(x.dtype).itemsize
    r = n // c
    row_bytes = c * itemsize
    sub = _sublane_multiple(x.dtype)
    tile_rows = _choose_tile_rows(r, row_bytes, sub, n * itemsize,
                                  _target_block_bytes())
    grid = (pl.cdiv(r, tile_rows),)

    x2d = jnp.reshape(x, (r, c))                   # metadata-only flatten

    y2d = pl.pallas_call(
        _copy_kernel,
        out_shape=jax.ShapeDtypeStruct((r, c), x.dtype),
        grid=grid,
        in_specs=[pl.BlockSpec((tile_rows, c), lambda i: (i, 0))],
        out_specs=pl.BlockSpec((tile_rows, c), lambda i: (i, 0)),
        compiler_params=pltpu.CompilerParams(
            dimension_semantics=("parallel",)),
        cost_estimate=pl.CostEstimate(
            flops=0, transcendentals=0, bytes_accessed=2 * n * itemsize),
    )(x2d)

    return jnp.reshape(y2d, out_shape)


if __name__ == "__main__":
    key = jax.random.PRNGKey(0)

    # Module: Squeeze(dim=1) applied to an NCHW tensor with a unit channel dim.
    x = jax.random.normal(key, (2, 1, 16, 16), dtype=jnp.float32)
    y = squeeze_pallas(x, dim=1)
    y = jax.block_until_ready(y)

    ref = jnp.squeeze(x, axis=1)
    assert y.shape == ref.shape == (2, 16, 16), (y.shape, ref.shape)
    assert y.dtype == x.dtype
    assert bool(jnp.array_equal(y, ref)), "value mismatch vs jnp.squeeze"

    # dim == 0 case (previously risked a pathological 1-wide-last-dim block).
    x0 = jax.random.normal(jax.random.PRNGKey(0), (1, 8, 128), dtype=jnp.float32)
    y0 = jax.block_until_ready(squeeze_pallas(x0, dim=0))
    assert y0.shape == (8, 128)
    assert bool(jnp.array_equal(y0, jnp.squeeze(x0, axis=0)))

    # Negative-dim squeeze of a unit trailing dim.
    xn = jax.random.normal(jax.random.PRNGKey(1), (2, 16, 1), dtype=jnp.float32)
    yn = jax.block_until_ready(squeeze_pallas(xn, dim=-1))
    assert yn.shape == (2, 16)
    assert bool(jnp.array_equal(yn, jnp.squeeze(xn, axis=-1)))

    # Non-unit dim: PyTorch squeeze is a no-op.
    y_noop = squeeze_pallas(x, dim=0)
    assert y_noop.shape == x.shape

    # Multi-step pipelined path (>2 MiB copy -> >=4 even grid steps).
    xb = jax.random.normal(jax.random.PRNGKey(2), (4, 1, 512, 512),
                           dtype=jnp.float32)
    yb = jax.block_until_ready(squeeze_pallas(xb, dim=1))
    assert yb.shape == (4, 512, 512)
    assert bool(jnp.array_equal(yb, jnp.squeeze(xb, axis=1)))

    print("KERNEL_OK")
</pallas_src>

<mosaic_0001>
module attributes {stable_mosaic.version = 11 : i64} {
  func.func @_copy_kernel(%arg0: i32, %arg1: memref<1x512xf32, #tpu.memory_space<vmem>>, %arg2: memref<1x512xf32, #tpu.memory_space<vmem>>) attributes {dimension_semantics = [#tpu.dimension_semantics<parallel>], iteration_bounds = array<i64: 1>, scalar_prefetch = 0 : i64, scratch_operands = 0 : i64, tpu.core_type = #tpu.core_type<tc>, window_params = [{transform_indices = @transform_0, window_bounds = array<i64: 1, 512>}, {transform_indices = @transform_1, window_bounds = array<i64: 1, 512>}]} {
    %c0 = arith.constant 0 : index
    %c0_0 = arith.constant 0 : index
    %0 = vector.load %arg1[%c0, %c0_0] : memref<1x512xf32, #tpu.memory_space<vmem>>, vector<1x512xf32>
    %c0_1 = arith.constant 0 : index
    %c0_2 = arith.constant 0 : index
    %1 = vector.load %arg2[%c0_1, %c0_2] : memref<1x512xf32, #tpu.memory_space<vmem>>, vector<1x512xf32>
    tpu.vector_store %arg2[%c0_1, %c0_2], %0 {strides = array<i32>} : memref<1x512xf32, #tpu.memory_space<vmem>>, vector<1x512xf32>,
    return
  }
  func.func @transform_0(%arg0: i32) -> (i32, i32) {
    %c0_i32 = arith.constant 0 : i32
    %c0_i32_0 = arith.constant 0 : i32
    return %arg0, %c0_i32 : i32, i32
  }
  func.func @transform_1(%arg0: i32) -> (i32, i32) {
    %c0_i32 = arith.constant 0 : i32
    %c0_i32_0 = arith.constant 0 : i32
    return %arg0, %c0_i32 : i32, i32
  }
}

</mosaic_0001>

<bundles_post_ra>
// kernel: tpu_custom_call.1
= control target key start
LH: loop header
LB: loop body
LE: loop exit
PB: predicated region body
PF: predicated region fallthrough
CT: control target
= control target key end

     0   :  { %6 = vsyncpa [#allocation3], 0  ;;  %s128_s0 = inlined_call_operand.hbm [shape: f32[1,512], index: 0, kind: input, shape index: {}]   ;;  %s129_s1 = inlined_call_operand.hbm [shape: f32[1,512], index: 1, kind: output, shape index: {}]  }
   0x1   :  { %7 = vsyncpa [#allocation4], 0  ;;  %s92_s6 = smov [#allocation2]   ;;  %s44_s10 = scalar_lea.hbm %s128_s0, 64 }
   0x2   :  { %s14_s7 = sshll.u32 %s92_s6, 4  ;;  %p45_p0 = scmp.ne.s32.totalorder %s128_s0, %s44_s10  ;;  %s15_s7 = int_to_ptr.vmem [resolvable:$true] %s14_s7 }
   0x3   :  { %p48_p1 = scmp.lt.u32.totalorder %s44_s10, %s128_s0 }
   0x5   :  { %p50_p2 = pnand %p48_p1, %p45_p0 }
   0x7   :  { %53 = shalt.err (!%p50_p2)
}
   0x8   :  { %s54_s15 = scalar_lea.vmem %s15_s7, 64  ;;  %p59_p4 = scmp.lt.s32.totalorder %s15_s7, %s15_s7 }
   0x9   :  { %p55_p3 = scmp.ne.s32.totalorder %s15_s7, %s54_s15  ;;  %p60_p5 = scmp.lt.s32.totalorder %s54_s15, %s54_s15 }
   0xb   :  { %p61_p6 = por %p60_p5, %p59_p4 }
   0xd   :  { %p62_p7 = pnand %p61_p6, %p55_p3 }
   0xf   :  { %65 = shalt.err (!%p62_p7)
}
  0x10   :  { %17 = dma.hbm_to_vmem [thread:$0]  %s128_s0, 64, %s15_s7, [#allocation3]  }
  0x11   :  { %88 = dma.done.wait [#allocation3], 64  }
  0x12   :  { %89 = vsyncadd [#allocation3], 4294967232  ;;  %v22_v0 = vlaneseq  ;;  %s93_s18 = smov [#allocation5]   ;;  %v21_v1 = vld [vmem:[#allocation2] sm:$0xf] }
  0x13   :  { %s33_s19 = sshll.u32 %s93_s18, 4  ;;  %s34_s19 = int_to_ptr.vmem [resolvable:$true] %s33_s19 }
  0x14   :  { %vm24_vm0 = vcmp.lt.s32.totalorder %v22_v0, 512  ;;  %s66_s20 = scalar_lea.vmem %s34_s19, 64  ;;  %p71_p9 = scmp.lt.s32.totalorder %s34_s19, %s34_s19 }
  0x15   :  { %26 = vst.msk [vmem:[#allocation5] sm:$0xf] %vm24_vm0, %v21_v1  ;;  %p67_p8 = scmp.ne.s32.totalorder %s34_s19, %s66_s20  ;;  %p72_p10 = scmp.lt.s32.totalorder %s66_s20, %s66_s20 }
  0x17   :  { %p73_p11 = por %p72_p10, %p71_p9 }
  0x19   :  { %p74_p12 = pnand %p73_p11, %p67_p8 }
  0x1b   :  { %77 = shalt.err (!%p74_p12)
}
  0x1c   :  { %s78_s0 = scalar_lea.hbm %s129_s1, 64 }
  0x1d   :  { %p79_p13 = scmp.ne.s32.totalorder %s129_s1, %s78_s0  ;;  %p82_p0 = scmp.lt.u32.totalorder %s78_s0, %s129_s1 }
  0x1f   :  { %p84_p1 = pnand %p82_p0, %p79_p13 }
  0x21   :  { %87 = shalt.err (!%p84_p1)
}
  0x22   :  { %36 = dma.vmem_to_hbm [thread:$0]  %s34_s19, 64, %s129_s1, [#allocation4]  }
  0x23   :  { %90 = dma.done.wait [#allocation4], 64  }
  0x24   :  { %91 = vsyncadd [#allocation4], 4294967232 }
  0x25   :  { %40 = vsyncpa [#allocation3], 1 }
  0x26   :  { %41 = vsyncpa [#allocation4], 1 }

</bundles_post_ra>
